<compile_context>
chip_gen: v7x
topology: tpu7x:2x2x1
jax: 0.10.0
libtpu: 0.0.40
codegen_flags: <defaults>
</compile_context>

<pallas_src>
import jax
import jax.numpy as jnp
from jax import lax
from jax.experimental import pallas as pl
from jax.experimental.pallas import tpu as pltpu

HID = 20  # hidden width of forward1, fixed by the PyTorch module


# ----------------------------- Pallas kernel -------------------------------

def _make_kernel(n_actions, dueling):
    """Kernel factory; n_actions / dueling are compile-time constants."""
    inv_a = 1.0 / float(n_actions)

    def kernel(x_ref, w1_ref, w2_ref, b1_ref, b2_ref, o_ref):
        # x_ref: (TB, F) batch-major tile. Contract its feature (minor) axis
        # directly against W1's minor axis (NT dot) -> h^T: (hid, TB) with the
        # batch dimension on the 128-lane axis.
        ht = lax.dot_general(
            w1_ref[...], x_ref[...],
            dimension_numbers=(((1,), (1,)), ((), ())),
            preferred_element_type=jnp.float32,
            precision=lax.Precision.DEFAULT,
        )
        ht = jnp.maximum(ht + b1_ref[...], 0.0)            # (hid, TB); b1 is (hid, 1)

        # Fused second layer: Y^T = [Wa | Wv] @ h^T + [ba | bv]  (or plain W2)
        yt = lax.dot_general(
            w2_ref[...], ht,
            dimension_numbers=(((1,), (0,)), ((), ())),
            preferred_element_type=jnp.float32,
            precision=lax.Precision.DEFAULT,
        ) + b2_ref[...]                                     # (A[+1], TB)

        if dueling:
            a = yt[:n_actions, :]                           # (A, TB), sublane-0 aligned
            v = yt[n_actions:n_actions + 1, :]              # (1, TB)
            a_mean = jnp.sum(a, axis=0, keepdims=True) * inv_a
            yt = v + (a - a_mean)                           # Q^T = V + (A - mean(A))

        o_ref[...] = yt.astype(o_ref.dtype)

    return kernel


# ------------------------------ JAX wrapper --------------------------------

def _round_up(x, m):
    return ((x + m - 1) // m) * m


def fuse_params(params, dueling):
    """One-time packing (do at init, not per call).

    Weights stay in torch (out, in) layout, which is exactly what the
    transposed kernel wants. Dueling heads are fused as [Advantage | Value]
    (advantage rows first -> sublane-0 aligned slice). Biases become columns.
    """
    if dueling:
        w2 = jnp.concatenate([params["wa"], params["wv"]], axis=0)   # (A+1, 20)
        b2 = jnp.concatenate([params["ba"], params["bv"]], axis=0)   # (A+1,)
    else:
        w2 = params["w2"]                                            # (A, 20)
        b2 = params["b2"]                                            # (A,)
    return {
        "w1": params["w1"],                 # (20, F)
        "w2": w2,                           # (A[+1], 20)
        "b1": params["b1"].reshape(-1, 1),  # (20, 1)
        "b2": b2.reshape(-1, 1),            # (A[+1], 1)
    }


def nn_model_forward(x, fused, dueling, *, out_batch_major=True):
    """Forward pass of NN_model as a single fused Pallas kernel.

    x:      (B, n_features) float32 (batch-major, as in nn.Linear)
    fused:  dict from fuse_params(): w1 (20, F), w2 (A[+1], 20), b1/b2 columns
    """
    B, F = x.shape
    w1, w2, b1, b2 = fused["w1"], fused["w2"], fused["b1"], fused["b2"]
    hid = w1.shape[0]
    rows2 = w2.shape[0]
    n_actions = rows2 - 1 if dueling else rows2

    # Batch-tile selection:
    #  * large cap (16384) so per-grid-step overhead is amortized; VMEM footprint
    #    stays at a few MiB, well under every generation's scoped-VMEM default;
    #  * a multiple of 128 when tiling, so output stores stay lane-dense;
    #  * aim for >= 2 grid steps so dimension_semantics=("parallel",) can shard
    #    the batch across both v7x TensorCores (harmless on v5e/v6e).
    CAP = 16384
    TB = min(CAP, _round_up(pl.cdiv(B, 2), 128))
    if TB >= B:
        TB = B  # single step; block dims equal full array dims (always legal)
    grid = (pl.cdiv(B, TB),)

    kernel = _make_kernel(n_actions, dueling)

    out_t = pl.pallas_call(
        kernel,
        out_shape=jax.ShapeDtypeStruct((n_actions, B), jnp.float32),
        grid=grid,
        in_specs=[
            pl.BlockSpec((TB, F), lambda i: (i, 0)),        # x: tiled over batch
            pl.BlockSpec((hid, F), lambda i: (0, 0)),       # W1: resident
            pl.BlockSpec((rows2, hid), lambda i: (0, 0)),   # fused W2: resident
            pl.BlockSpec((hid, 1), lambda i: (0, 0)),       # b1 column: resident
            pl.BlockSpec((rows2, 1), lambda i: (0, 0)),     # fused b2 column: resident
        ],
        out_specs=pl.BlockSpec((n_actions, TB), lambda i: (0, i)),
        compiler_params=pltpu.CompilerParams(
            dimension_semantics=("parallel",),              # shard batch across TCs (v7x)
        ),
    )(x, w1, w2, b1, b2)

    if out_batch_major:
        # Match the PyTorch module's (B, n_actions) output. One small XLA
        # transpose over an (A, B) array; pass out_batch_major=False if the
        # consumer can take action-major output and avoid it.
        return out_t.T
    return out_t


def init_params(key, n_features, n_actions, dueling):
    """Deterministic init mirroring the PyTorch module: weight ~ N(0, 0.3), bias = 0.1.

    Weights stored in torch layout (out_features, in_features)."""
    ks = jax.random.split(key, 4)
    std = 0.3
    params = {
        "w1": std * jax.random.normal(ks[0], (HID, n_features), jnp.float32),
        "b1": jnp.full((HID,), 0.1, jnp.float32),
    }
    if dueling:
        params["wv"] = std * jax.random.normal(ks[1], (1, HID), jnp.float32)
        params["bv"] = jnp.full((1,), 0.1, jnp.float32)
        params["wa"] = std * jax.random.normal(ks[2], (n_actions, HID), jnp.float32)
        params["ba"] = jnp.full((n_actions,), 0.1, jnp.float32)
    else:
        params["w2"] = std * jax.random.normal(ks[3], (n_actions, HID), jnp.float32)
        params["b2"] = jnp.full((n_actions,), 0.1, jnp.float32)
    return params


def reference_forward(x, params, dueling):
    """Pure-JAX reference (unfused params) for correctness checking."""
    h = jnp.maximum(x @ params["w1"].T + params["b1"], 0.0)
    if dueling:
        v = h @ params["wv"].T + params["bv"]
        a = h @ params["wa"].T + params["ba"]
        return v + (a - jnp.mean(a, axis=1, keepdims=True))
    return h @ params["w2"].T + params["b2"]


if __name__ == "__main__":
    key = jax.random.PRNGKey(0)
    kx, kx2, kp = jax.random.split(key, 3)

    n_features = 16
    n_actions = 4

    # Small batch (single grid step): dueling and non-dueling paths.
    x = jax.random.normal(kx, (8, n_features), jnp.float32)

    params = init_params(kp, n_features, n_actions, dueling=True)
    fused = fuse_params(params, dueling=True)
    out = jax.block_until_ready(nn_model_forward(x, fused, dueling=True))
    ref = reference_forward(x, params, dueling=True)
    assert out.shape == (8, n_actions)
    assert jnp.allclose(out, ref, atol=1e-4, rtol=1e-4)

    params_nd = init_params(kp, n_features, n_actions, dueling=False)
    fused_nd = fuse_params(params_nd, dueling=False)
    out_nd = jax.block_until_ready(nn_model_forward(x, fused_nd, dueling=False))
    ref_nd = reference_forward(x, params_nd, dueling=False)
    assert out_nd.shape == (8, n_actions)
    assert jnp.allclose(out_nd, ref_nd, atol=1e-4, rtol=1e-4)

    # Larger batch: exercises the multi-step grid (TB=256, 2 steps) and a
    # partial (clipped) final batch tile.
    xb = jax.random.normal(kx2, (300, n_features), jnp.float32)
    out_b = jax.block_until_ready(nn_model_forward(xb, fused, dueling=True))
    ref_b = reference_forward(xb, params, dueling=True)
    assert out_b.shape == (300, n_actions)
    assert jnp.allclose(out_b, ref_b, atol=1e-4, rtol=1e-4)

    print("KERNEL_OK")
</pallas_src>

<mosaic_0001>
module attributes {stable_mosaic.version = 11 : i64} {
  func.func @kernel(%arg0: i32, %arg1: memref<8x16xf32, #tpu.memory_space<vmem>>, %arg2: memref<20x16xf32, #tpu.memory_space<vmem>>, %arg3: memref<5x20xf32, #tpu.memory_space<vmem>>, %arg4: memref<20x1xf32, #tpu.memory_space<vmem>>, %arg5: memref<5x1xf32, #tpu.memory_space<vmem>>, %arg6: memref<4x8xf32, #tpu.memory_space<vmem>>) attributes {dimension_semantics = [#tpu.dimension_semantics<parallel>], iteration_bounds = array<i64: 1>, scalar_prefetch = 0 : i64, scratch_operands = 0 : i64, tpu.core_type = #tpu.core_type<tc>, window_params = [{transform_indices = @transform_0, window_bounds = array<i64: 8, 16>}, {pipeline_mode = #tpu.pipeline_mode<synchronous>, transform_indices = @transform_1, window_bounds = array<i64: 20, 16>}, {pipeline_mode = #tpu.pipeline_mode<synchronous>, transform_indices = @transform_2, window_bounds = array<i64: 5, 20>}, {pipeline_mode = #tpu.pipeline_mode<synchronous>, transform_indices = @transform_3, window_bounds = array<i64: 20, 1>}, {pipeline_mode = #tpu.pipeline_mode<synchronous>, transform_indices = @transform_4, window_bounds = array<i64: 5, 1>}, {transform_indices = @transform_5, window_bounds = array<i64: 4, 8>}]} {
    %c0 = arith.constant 0 : index
    %c0_0 = arith.constant 0 : index
    %0 = vector.load %arg2[%c0, %c0_0] : memref<20x16xf32, #tpu.memory_space<vmem>>, vector<20x16xf32>
    %c0_1 = arith.constant 0 : index
    %c0_2 = arith.constant 0 : index
    %1 = vector.load %arg1[%c0_1, %c0_2] : memref<8x16xf32, #tpu.memory_space<vmem>>, vector<8x16xf32>
    %cst = arith.constant dense<0.000000e+00> : vector<20x8xf32>
    %2 = tpu.matmul %0, %1, %cst {dimension_numbers = #tpu.dot_dimension_numbers<[1], [1], [0], [0], [0, 0, 1, 0], [], []>} : vector<20x16xf32>, vector<8x16xf32>, vector<20x8xf32> -> vector<20x8xf32>
    %c0_3 = arith.constant 0 : index
    %c0_4 = arith.constant 0 : index
    %3 = vector.load %arg4[%c0_3, %c0_4] : memref<20x1xf32, #tpu.memory_space<vmem>>, vector<20x1xf32>
    %4 = vector.broadcast %3 : vector<20x1xf32> to vector<20x8xf32>
    %5 = arith.addf %2, %4 : vector<20x8xf32>
    %cst_5 = arith.constant 0.000000e+00 : f32
    %6 = vector.broadcast %cst_5 : f32 to vector<20x8xf32>
    %7 = arith.maximumf %5, %6 : vector<20x8xf32>
    %c0_6 = arith.constant 0 : index
    %c0_7 = arith.constant 0 : index
    %8 = vector.load %arg3[%c0_6, %c0_7] : memref<5x20xf32, #tpu.memory_space<vmem>>, vector<5x20xf32>
    %cst_8 = arith.constant dense<0.000000e+00> : vector<5x8xf32>
    %9 = tpu.matmul %8, %7, %cst_8 {dimension_numbers = #tpu.dot_dimension_numbers<[1], [0], [0], [1], [0, 0, 1, 1], [], []>} : vector<5x20xf32>, vector<20x8xf32>, vector<5x8xf32> -> vector<5x8xf32>
    %c0_9 = arith.constant 0 : index
    %c0_10 = arith.constant 0 : index
    %10 = vector.load %arg5[%c0_9, %c0_10] : memref<5x1xf32, #tpu.memory_space<vmem>>, vector<5x1xf32>
    %11 = vector.broadcast %10 : vector<5x1xf32> to vector<5x8xf32>
    %12 = arith.addf %9, %11 : vector<5x8xf32>
    %13 = vector.extract_strided_slice %12 {offsets = [0, 0], sizes = [4, 8], strides = [1, 1]} : vector<5x8xf32> to vector<4x8xf32>
    %14 = vector.extract_strided_slice %12 {offsets = [4, 0], sizes = [1, 8], strides = [1, 1]} : vector<5x8xf32> to vector<1x8xf32>
    %cst_11 = arith.constant dense<0.000000e+00> : vector<8xf32>
    %15 = vector.multi_reduction <add>, %13, %cst_11 [0] : vector<4x8xf32> to vector<8xf32>
    %16 = vector.shape_cast %15 : vector<8xf32> to vector<1x8xf32>
    %cst_12 = arith.constant 2.500000e-01 : f32
    %17 = vector.broadcast %cst_12 : f32 to vector<1x8xf32>
    %18 = arith.mulf %16, %17 : vector<1x8xf32>
    %19 = vector.broadcast %18 : vector<1x8xf32> to vector<4x8xf32>
    %20 = arith.subf %13, %19 : vector<4x8xf32>
    %21 = vector.broadcast %14 : vector<1x8xf32> to vector<4x8xf32>
    %22 = arith.addf %21, %20 : vector<4x8xf32>
    %c0_13 = arith.constant 0 : index
    %c0_14 = arith.constant 0 : index
    %23 = vector.load %arg6[%c0_13, %c0_14] : memref<4x8xf32, #tpu.memory_space<vmem>>, vector<4x8xf32>
    tpu.vector_store %arg6[%c0_13, %c0_14], %22 {strides = array<i32>} : memref<4x8xf32, #tpu.memory_space<vmem>>, vector<4x8xf32>,
    return
  }
  func.func @transform_0(%arg0: i32) -> (i32, i32) {
    %c0_i32 = arith.constant 0 : i32
    %c0_i32_0 = arith.constant 0 : i32
    return %arg0, %c0_i32 : i32, i32
  }
  func.func @transform_1(%arg0: i32) -> (i32, i32) {
    %c0_i32 = arith.constant 0 : i32
    %c0_i32_0 = arith.constant 0 : i32
    %c0_i32_1 = arith.constant 0 : i32
    return %c0_i32, %c0_i32_0 : i32, i32
  }
  func.func @transform_2(%arg0: i32) -> (i32, i32) {
    %c0_i32 = arith.constant 0 : i32
    %c0_i32_0 = arith.constant 0 : i32
    %c0_i32_1 = arith.constant 0 : i32
    return %c0_i32, %c0_i32_0 : i32, i32
  }
  func.func @transform_3(%arg0: i32) -> (i32, i32) {
    %c0_i32 = arith.constant 0 : i32
    %c0_i32_0 = arith.constant 0 : i32
    %c0_i32_1 = arith.constant 0 : i32
    return %c0_i32, %c0_i32_0 : i32, i32
  }
  func.func @transform_4(%arg0: i32) -> (i32, i32) {
    %c0_i32 = arith.constant 0 : i32
    %c0_i32_0 = arith.constant 0 : i32
    %c0_i32_1 = arith.constant 0 : i32
    return %c0_i32, %c0_i32_0 : i32, i32
  }
  func.func @transform_5(%arg0: i32) -> (i32, i32) {
    %c0_i32 = arith.constant 0 : i32
    %c0_i32_0 = arith.constant 0 : i32
    return %c0_i32, %arg0 : i32, i32
  }
}

</mosaic_0001>

<bundles_post_ra>
// kernel: tpu_custom_call.1
= control target key start
LH: loop header
LB: loop body
LE: loop exit
PB: predicated region body
PF: predicated region fallthrough
CT: control target
= control target key end

     0   :  { %vm43_vm0 = vcmask 130048   ;;  %v322_v1 = vmov 0.0   ;;  %vm323_vm1 = vmmov 0   ;;  %v324_v4 = vmov 0   ;;  %s406_s0 = inlined_call_operand.vmem [shape: f32[8,16], index: 0, kind: input, shape index: {}]   ;;  %s407_s1 = inlined_call_operand.vmem [shape: f32[20,16], index: 1, kind: input, shape index: {}]   ;;  %s408_s2 = inlined_call_operand.vmem [shape: f32[5,20], index: 2, kind: input, shape index: {}]   ;;  %s409_s3 = inlined_call_operand.vmem [shape: f32[20,1], index: 3, kind: input, shape index: {}]   ;;  %s410_s4 = inlined_call_operand.vmem [shape: f32[5,1], index: 4, kind: input, shape index: {}]   ;;  %s411_s5 = inlined_call_operand.hbm [shape: f32[4,8], index: 5, kind: output, shape index: {}]  }
   0x1   :  { %v24_v0 = vld [vmem:[%s406_s0] sm:$0xff]  ;;  %268 = vmatprep.subr.mxu0 %v322_v1  ;;  %270 = vmatprep.mubr.msk.f32.mxu0 %vm323_vm1, %v322_v1  ;;  %v27_v5 = vld [vmem:[%s409_s3 + $0x10] sm:$0xf] }
   0x2   :  { %v25_v2 = vld [vmem:[%s409_s3] sm:$0xff]  ;;  %269 = vmatpush3.xpose.msk.msra.mxu0 %vm43_vm0, %v24_v0  ;;  %296 = vset.pattern.permute.xlu0 %v324_v4 }
   0x3   :  { %v21_v3 = vld [vmem:[%s407_s1] sm:$0xff] }
   0x4   :  { %10 = vsyncpa [#allocation3], 0  ;;  %30 = vperm.xlu0 %296, %v25_v2   ;;  %297 = vset.pattern.permute.xlu1 %v324_v4  ;;  %v26_v6 = vld [vmem:[%s409_s3 + $0x8] sm:$0xff]  ;;  %v140_v7 = vld [vmem:[%s410_s4] sm:$0x1f]  ;;  %v325_v10 = vmov 0.0|0.0   ;;  %v234_v34 = vlaneseq }
   0x5   :  { %40 = vperm.xlu1 %297, %v27_v5   ;;  %285 = vmatprep.mubr.msk.f32.mxu1 %vm323_vm1, %v322_v1  ;;  %v22_v8 = vld [vmem:[%s407_s1 + $0x8] sm:$0xff]  ;;  %v23_v9 = vld [vmem:[%s407_s1 + $0x10] sm:$0xf]  ;;  %vm150_vm2 = vcmask 1043456   ;;  %v139_v27 = vld [vmem:[%s408_s2] sm:$0x1f] }
   0x6   :  { %271 = vmatmul.mubr.msk.f32.vlgmr.msra.gmra.mrb[0].mxu0 %vm43_vm0, %v21_v3  ;;  %288 = vmatprep.subr.bf16.mxu1 %v325_v10  ;;  %vm146_vm3 = vcmask 162816   ;;  %vm224_vm4 = vcmask 60416   ;;  %v235_v37 = vshrl.u32 %v234_v34, 7  ;;  %s326_s2 = smov [#allocation2]  }
   0x7   :  { %273 = vmatprep.mubr.msk.f32.mxu0 %vm323_vm1, %v322_v1  ;;  %s246_s7 = sshll.u32 %s326_s2, 4  ;;  %s247_s7 = int_to_ptr.vmem [resolvable:$true] %s246_s7 }
   0x8   :  { %35 = vperm.xlu0 %296, %v26_v6   ;;  %v236_v40 = vsub.s32 4, %v235_v37  ;;  %s298_s8 = scalar_lea.vmem %s247_s7, 64  ;;  %p303_p1 = scmp.lt.s32.totalorder %s247_s7, %s247_s7 }
   0x9   :  { %143 = vperm.xlu1 %297, %v140_v7   ;;  %p299_p0 = scmp.ne.s32.totalorder %s247_s7, %s298_s8  ;;  %p304_p2 = scmp.lt.s32.totalorder %s298_s8, %s298_s8 }
   0xa   :  { %274 = vmatmul.mubr.msk.f32.gmra.mrb[2].mxu0 %vm43_vm0, %v22_v8 }
   0xb   :  { %276 = vmatprep.mubr.msk.f32.mxu0 %vm323_vm1, %v322_v1  ;;  %p305_p3 = por %p304_p2, %p303_p1 }
   0xd   :  { %p306_p4 = pnand %p305_p3, %p299_p0 }
   0xe   :  { %277 = vmatmul.mubr.msk.f32.gmra.mrb[4].mxu0 %vm43_vm0, %v23_v9 }
  0x83   :  { %v31_v11 = vpop.permute.xlu0 %30 }
  0x84   :  { %v41_v21 = vpop.permute.xlu1 %40 }
  0x87   :  { %v36_v15 = vpop.permute.xlu0 %35 }
  0x88   :  { %v144_v28 = vpop.permute.xlu1 %143 }
  0xd9   :  { %v122_v12 = vpop.f32.mrb[0].mxu0 }
  0xda   :  { %v272_v13 = vpop.f32.mrb[1].mxu0  ;;  %v123_v14 = vadd.f32 %v122_v12, %v31_v11 }
  0xdc   :  { %v136_v19 = vmax.f32 %v123_v14, 0.0 }
  0xdd   :  { %v127_v16 = vpop.f32.mrb[2].mxu0 }
  0xde   :  { %v128_v17 = vadd.f32 %v127_v16, %v36_v15  ;;  %v275_v18 = vpop.f32.mrb[3].mxu0 }
  0xe0   :  { %v137_v20 = vmax.f32 %v128_v17, 0.0 }
  0xe1   :  { %v132_v22 = vpop.f32.mrb[4].mxu0 }
  0xe2   :  { %v133_v23 = vadd.f32 %v132_v22, %v41_v21  ;;  %v278_v24 = vpop.f32.mrb[5].mxu0  ;;  %v289_v25 = vpack.c.bf16 %v137_v20, %v136_v19 }
  0xe4   :  { %v138_v26 = vmax.f32 %v133_v23, 0.0  ;;  %290 = vmatpush3.bf16.msra.mxu1 %v289_v25 }
  0xe5   :  { %283 = vmatprep.subr.mxu1 %v322_v1 }
  0xe8   :  { %284 = vmatpush3.msk.msra.mxu1 %vm150_vm2, %v138_v26 }
  0xe9   :  { %286 = vmatmul.mubr.msk.f32.vlgmr.msra.gmra.mrb[0].mxu1 %vm146_vm3, %v139_v27 }
 0x1bc   :  { %v220_v29 = vpop.f32.mrb[0].mxu1 }
 0x1bd   :  { %v221_v30 = vadd.f32 %v220_v29, %v144_v28  ;;  %v287_v31 = vpop.f32.mrb[1].mxu1 }
 0x1bf   :  { %v225_v32 = vsel %vm224_vm4, %v221_v30, 0.0  ;;  %v237_v43 = vrot.slane %v221_v30, %v236_v40 }
 0x1c0   :  { %v226_v33 = vrot.slane %v225_v32, 4 }
 0x1c2   :  { %v227_v35 = vadd.f32 %v226_v33, %v225_v32 }
 0x1c4   :  { %v228_v36 = vrot.slane %v227_v35, 2 }
 0x1c6   :  { %v229_v38 = vadd.f32 %v228_v36, %v227_v35 }
 0x1c8   :  { %v230_v39 = vrot.slane %v229_v38, 1 }
 0x1ca   :  { %v231_v41 = vadd.f32 %v230_v39, %v229_v38 }
 0x1cc   :  { %v232_v42 = vmul.f32 0.25, %v231_v41 }
 0x1ce   :  { %v233_v44 = vsub.f32 %v221_v30, %v232_v42 }
 0x1d0   :  { %v238_v45 = vadd.f32 %v237_v43, %v233_v44 }
 0x1d2   :  { %239 = vst.msk [vmem:[#allocation2] sm:$0xf] %vm224_vm4, %v238_v45 }
 0x1d3   :  { %309 = shalt.err (!%p306_p4)
}
 0x1d4   :  { %s310_s11 = scalar_lea.hbm %s411_s5, 64 }
 0x1d5   :  { %p311_p5 = scmp.ne.s32.totalorder %s411_s5, %s310_s11  ;;  %p314_p6 = scmp.lt.u32.totalorder %s310_s11, %s411_s5 }
 0x1d7   :  { %p316_p7 = pnand %p314_p6, %p311_p5 }
 0x1d9   :  { %319 = shalt.err (!%p316_p7)
}
 0x1da   :  { %249 = dma.vmem_to_hbm [thread:$0]  %s247_s7, 64, %s411_s5, [#allocation3]  }
 0x1db   :  { %320 = dma.done.wait [#allocation3], 64  }
 0x1dc   :  { %321 = vsyncadd [#allocation3], 4294967232 }
 0x1dd   :  { %253 = vsyncpa [#allocation3], 1 }

</bundles_post_ra>
